<compile_context>
chip_gen: v7x
topology: tpu7x:2x2x1
jax: 0.10.0
libtpu: 0.0.40
codegen_flags: <defaults>
</compile_context>

<pallas_src>
import functools

import jax
import jax.numpy as jnp
from jax.experimental import pallas as pl
from jax.experimental.pallas import tpu as pltpu

_LANE = 128           # lane width: pad the tiny A dim up to this
_B_TILE = 512         # rows per grid step on the batch-tiled path
_SMALL_B = 512        # at/below this, use the single-block grid-less path


def _cls_kernel(x_ref, w_ref, b_ref, o_ref):
    # Hot path: MXU matmul (f32 accumulate) + broadcast bias add.
    acc = jnp.dot(x_ref[...], w_ref[...], preferred_element_type=jnp.float32)
    o_ref[...] = (acc + b_ref[...]).astype(o_ref.dtype)


def _pad_params(w, b):
    """Zero-pad the A (output) dim of w/b up to a full 128-lane slab."""
    H, A = w.shape
    a_pad = max(_LANE, ((A + _LANE - 1) // _LANE) * _LANE)
    if A != a_pad:
        w = jnp.pad(w, ((0, 0), (0, a_pad - A)))
        b = jnp.pad(b, ((0, 0), (0, a_pad - A)))
    return w, b, a_pad


def _cost(B, H, A_pad, itemsize):
    flops = 2 * B * H * A_pad
    bytes_accessed = itemsize * (B * H + H * A_pad + A_pad + B * A_pad)
    return pl.CostEstimate(flops=flops, transcendentals=0,
                           bytes_accessed=bytes_accessed)


@functools.partial(jax.jit, static_argnames=("out_features",))
def _cls_small(x, w_pad, b_pad, out_features):
    """Grid-less single-block path: everything lives in VMEM for one call."""
    B, H = x.shape
    A_pad = w_pad.shape[1]
    out = pl.pallas_call(
        _cls_kernel,
        out_shape=jax.ShapeDtypeStruct((B, A_pad), x.dtype),
        in_specs=[
            pl.BlockSpec(memory_space=pltpu.VMEM),
            pl.BlockSpec(memory_space=pltpu.VMEM),
            pl.BlockSpec(memory_space=pltpu.VMEM),
        ],
        out_specs=pl.BlockSpec(memory_space=pltpu.VMEM),
        cost_estimate=_cost(B, H, A_pad, x.dtype.itemsize),
    )(x, w_pad, b_pad)
    return out[:, :out_features]


@functools.partial(jax.jit, static_argnames=("out_features",))
def _cls_tiled(x, w_pad, b_pad, out_features):
    """Batch-tiled path: grid over B, weight/bias resident, B axis parallel."""
    B, H = x.shape
    A_pad = w_pad.shape[1]
    bt = _B_TILE
    out = pl.pallas_call(
        _cls_kernel,
        out_shape=jax.ShapeDtypeStruct((B, A_pad), x.dtype),
        grid_spec=pltpu.PrefetchScalarGridSpec(
            num_scalar_prefetch=0,
            grid=(pl.cdiv(B, bt),),
            in_specs=[
                pl.BlockSpec((bt, H), lambda i: (i, 0)),
                pl.BlockSpec((H, A_pad), lambda i: (0, 0)),   # stays resident
                pl.BlockSpec((1, A_pad), lambda i: (0, 0)),   # stays resident
            ],
            out_specs=pl.BlockSpec((bt, A_pad), lambda i: (i, 0)),
        ),
        compiler_params=pltpu.CompilerParams(
            dimension_semantics=("parallel",),   # shards across v7x's 2 TCs
        ),
        cost_estimate=_cost(B, H, A_pad, x.dtype.itemsize),
    )(x, w_pad, b_pad)
    return out[:, :out_features]


def cls_forward(x, w, b):
    """Computes x @ w + b (== PyTorch's self.fc(x)).

    x: [B, H] float32
    w: [H, A] float32   (transpose of PyTorch fc.weight)
    b: [1, A] float32
    returns: [B, A] float32
    """
    B, H = x.shape
    H2, A = w.shape
    assert H == H2 and b.shape == (1, A)

    w_pad, b_pad, _ = _pad_params(w, b)
    if B <= _SMALL_B:
        return _cls_small(x, w_pad, b_pad, A)
    return _cls_tiled(x, w_pad, b_pad, A)


if __name__ == "__main__":
    hdim = 256
    attack_type = 4
    batch = 8

    key = jax.random.PRNGKey(0)
    kx, kw, kb, kx2 = jax.random.split(key, 4)

    # PyTorch fc.weight has shape [attack_type, hdim]; we store its transpose.
    x = jax.random.normal(kx, (batch, hdim), dtype=jnp.float32)
    w_torch_layout = jax.random.normal(kw, (attack_type, hdim), dtype=jnp.float32) * 0.05
    w = jnp.transpose(w_torch_layout)            # [hdim, attack_type]
    b = jax.random.normal(kb, (1, attack_type), dtype=jnp.float32) * 0.05

    # Small-batch (grid-less) path.
    out = jax.block_until_ready(cls_forward(x, w, b))
    ref = x @ w + b
    assert out.shape == (batch, attack_type)
    assert jnp.allclose(out, ref, atol=1e-4, rtol=1e-4)

    # Large-batch (tiled, parallel-grid) path.
    big_batch = 1024
    x_big = jax.random.normal(kx2, (big_batch, hdim), dtype=jnp.float32)
    out_big = jax.block_until_ready(cls_forward(x_big, w, b))
    ref_big = x_big @ w + b
    assert out_big.shape == (big_batch, attack_type)
    assert jnp.allclose(out_big, ref_big, atol=1e-4, rtol=1e-4)

    print("KERNEL_OK")
</pallas_src>

<mosaic_0001>
module attributes {stable_mosaic.version = 11 : i64} {
  func.func @_cls_kernel(%arg0: memref<8x256xf32, #tpu.memory_space<vmem>>, %arg1: memref<256x128xf32, #tpu.memory_space<vmem>>, %arg2: memref<1x128xf32, #tpu.memory_space<vmem>>, %arg3: memref<8x128xf32, #tpu.memory_space<vmem>>) attributes {dimension_semantics = [], scalar_prefetch = 0 : i64, scratch_operands = 0 : i64, tpu.core_type = #tpu.core_type<tc>} {
    %c0 = arith.constant 0 : index
    %c0_0 = arith.constant 0 : index
    %0 = vector.load %arg0[%c0, %c0_0] : memref<8x256xf32, #tpu.memory_space<vmem>>, vector<8x256xf32>
    %c0_1 = arith.constant 0 : index
    %c0_2 = arith.constant 0 : index
    %1 = vector.load %arg1[%c0_1, %c0_2] : memref<256x128xf32, #tpu.memory_space<vmem>>, vector<256x128xf32>
    %cst = arith.constant dense<0.000000e+00> : vector<8x128xf32>
    %2 = tpu.matmul %0, %1, %cst {dimension_numbers = #tpu.dot_dimension_numbers<[1], [0], [0], [1], [0, 0, 1, 1], [], []>} : vector<8x256xf32>, vector<256x128xf32>, vector<8x128xf32> -> vector<8x128xf32>
    %c0_3 = arith.constant 0 : index
    %c0_4 = arith.constant 0 : index
    %3 = vector.load %arg2[%c0_3, %c0_4] : memref<1x128xf32, #tpu.memory_space<vmem>>, vector<1x128xf32>
    %4 = vector.broadcast %3 : vector<1x128xf32> to vector<8x128xf32>
    %5 = arith.addf %2, %4 : vector<8x128xf32>
    %c0_5 = arith.constant 0 : index
    %c0_6 = arith.constant 0 : index
    %6 = vector.load %arg3[%c0_5, %c0_6] : memref<8x128xf32, #tpu.memory_space<vmem>>, vector<8x128xf32>
    tpu.vector_store %arg3[%c0_5, %c0_6], %5 {strides = array<i32>} : memref<8x128xf32, #tpu.memory_space<vmem>>, vector<8x128xf32>,
    return
  }
}

</mosaic_0001>

<bundles_post_ra>
// kernel: _cls_small.1
= control target key start
LH: loop header
LB: loop body
LE: loop exit
PB: predicated region body
PF: predicated region fallthrough
CT: control target
= control target key end

     0   :  { %8 = vsyncpa [#allocation3], 0  ;;  %s339_s0 = inlined_call_operand.hbm [shape: f32[8,256], index: 0, kind: input, shape index: {}]   ;;  %s340_s1 = inlined_call_operand.hbm [shape: f32[256,128], index: 1, kind: input, shape index: {}]   ;;  %s341_s2 = inlined_call_operand.vmem [shape: f32[1,128], index: 2, kind: input, shape index: {}]   ;;  %s342_s3 = inlined_call_operand.vmem [shape: f32[8,128], index: 3, kind: output, shape index: {}]  }
   0x1   :  { %9 = vsyncpa [#allocation5], 0  ;;  %s278_s12 = smov [#allocation2]   ;;  %s279_s14 = smov [#allocation4]  }
   0x2   :  { %s16_s13 = sshll.u32 %s278_s12, 4  ;;  %s25_s15 = sshll.u32 %s279_s14, 4  ;;  %s17_s13 = int_to_ptr.vmem [resolvable:$true] %s16_s13  ;;  %s302_s15 = int_to_ptr.vmem [resolvable:$true] %s25_s15 }
   0x3   :  { %s230_s18 = scalar_lea.hbm %s339_s0, 256 }
   0x4   :  { %p231_p0 = scmp.ne.s32.totalorder %s339_s0, %s230_s18  ;;  %p234_p1 = scmp.lt.u32.totalorder %s230_s18, %s339_s0 }
   0x6   :  { %p236_p2 = pnand %p234_p1, %p231_p0 }
   0x8   :  { %239 = shalt.err (!%p236_p2)
}
   0x9   :  { %s240_s23 = scalar_lea.vmem %s17_s13, 256  ;;  %p245_p4 = scmp.lt.s32.totalorder %s17_s13, %s17_s13 }
   0xa   :  { %p241_p3 = scmp.ne.s32.totalorder %s17_s13, %s240_s23  ;;  %p246_p5 = scmp.lt.s32.totalorder %s240_s23, %s240_s23 }
   0xc   :  { %p247_p6 = por %p246_p5, %p245_p4 }
   0xe   :  { %p248_p7 = pnand %p247_p6, %p241_p3 }
  0x10   :  { %251 = shalt.err (!%p248_p7)
}
  0x11   :  { %19 = dma.hbm_to_vmem [thread:$0]  %s339_s0, 256, %s17_s13, [#allocation3]  }
  0x12   :  { %s252_s28 = scalar_lea.hbm %s340_s1, 4096 }
  0x13   :  { %p253_p8 = scmp.ne.s32.totalorder %s340_s1, %s252_s28  ;;  %p256_p9 = scmp.lt.u32.totalorder %s252_s28, %s340_s1 }
  0x15   :  { %p258_p10 = pnand %p256_p9, %p253_p8 }
  0x17   :  { %261 = shalt.err (!%p258_p10)
}
  0x18   :  { %s262_s6 = scalar_lea.vmem %s302_s15, 4096  ;;  %p267_p12 = scmp.lt.s32.totalorder %s302_s15, %s302_s15 }
  0x19   :  { %p263_p11 = scmp.ne.s32.totalorder %s302_s15, %s262_s6  ;;  %p268_p13 = scmp.lt.s32.totalorder %s262_s6, %s262_s6 }
  0x1b   :  { %p269_p0 = por %p268_p13, %p267_p12 }
  0x1d   :  { %p270_p1 = pnand %p269_p0, %p263_p11 }
  0x1f   :  { %273 = shalt.err (!%p270_p1)
}
  0x20   :  { %s280_s0 = smov 128   ;;  %s281_s7 = smov 8  }
  0x21   :  { %31 = dma.hbm_to_vmem [thread:$0]  %s340_s1, 4096, %s302_s15, [#allocation5], %s280_s0, %s280_s0, %s281_s7  }
  0x22   :  { %274 = dma.done.wait [#allocation3], 256  }
  0x23   :  { %275 = vsyncadd [#allocation3], 4294967040 }
  0x24   :  { %276 = dma.done.wait [#allocation5], 4096  }
  0x25   :  { %277 = vsyncadd [#allocation5], 4294963200  ;;  %v58_v0 = vld [vmem:[#allocation4 + $0x80] sm:$0xff]  ;;  %v59_v1 = vld [vmem:[#allocation4 + $0x88] sm:$0xff] }
  0x26   :  { %v42_v2 = vld [vmem:[#allocation4] sm:$0xff]  ;;  %v194_v3 = vpack.c.bf16 %v59_v1, %v58_v0  ;;  %v43_v4 = vld [vmem:[#allocation4 + $0x8] sm:$0xff]  ;;  %v60_v5 = vld [vmem:[#allocation4 + $0x90] sm:$0xff] }
  0x27   :  { %v61_v6 = vld [vmem:[#allocation4 + $0x98] sm:$0xff]  ;;  %v196_v7 = vpack.c.bf16 %v43_v4, %v42_v2  ;;  %v44_v9 = vld [vmem:[#allocation4 + $0x10] sm:$0xff]  ;;  %v62_v11 = vld [vmem:[#allocation4 + $0xa0] sm:$0xff] }
  0x28   :  { %v198_v8 = vpack.c.bf16 %v61_v6, %v60_v5  ;;  %v45_v10 = vld [vmem:[#allocation4 + $0x18] sm:$0xff]  ;;  %195 = vmatprep.subr.bf16.mxu0 %v194_v3  ;;  %v63_v12 = vld [vmem:[#allocation4 + $0xa8] sm:$0xff]  ;;  %v46_v15 = vld [vmem:[#allocation4 + $0x20] sm:$0xff] }
  0x29   :  { %197 = vmatpush3.bf16.msra.mxu0 %v196_v7  ;;  %v200_v13 = vpack.c.bf16 %v45_v10, %v44_v9  ;;  %v202_v14 = vpack.c.bf16 %v63_v12, %v62_v11  ;;  %v47_v16 = vld [vmem:[#allocation4 + $0x28] sm:$0xff]  ;;  %v64_v17 = vld [vmem:[#allocation4 + $0xb0] sm:$0xff]  ;;  %v65_v18 = vld [vmem:[#allocation4 + $0xb8] sm:$0xff] }
  0x2a   :  { %199 = vmatprep.subr.bf16.mxu0 %v198_v8  ;;  %v204_v19 = vpack.c.bf16 %v47_v16, %v46_v15  ;;  %v206_v20 = vpack.c.bf16 %v65_v18, %v64_v17  ;;  %v48_v21 = vld [vmem:[#allocation4 + $0x30] sm:$0xff]  ;;  %v49_v22 = vld [vmem:[#allocation4 + $0x38] sm:$0xff]  ;;  %v66_v23 = vld [vmem:[#allocation4 + $0xc0] sm:$0xff] }
  0x2b   :  { %v67_v24 = vld [vmem:[#allocation4 + $0xc8] sm:$0xff]  ;;  %v41_v25 = vld [vmem:[#allocation2 + $0x8] sm:$0xff]  ;;  %v208_v26 = vpack.c.bf16 %v49_v22, %v48_v21  ;;  %v50_v28 = vld [vmem:[#allocation4 + $0x40] sm:$0xff] }
  0x2c   :  { %145 = vmatprep.mubr.f32.mxu0 %v41_v25  ;;  %v210_v27 = vpack.c.bf16 %v67_v24, %v66_v23  ;;  %v51_v29 = vld [vmem:[#allocation4 + $0x48] sm:$0xff]  ;;  %v68_v30 = vld [vmem:[#allocation4 + $0xd0] sm:$0xff]  ;;  %v69_v31 = vld [vmem:[#allocation4 + $0xd8] sm:$0xff] }
  0x2d   :  { %201 = vmatpush3.bf16.msra.mxu0 %v200_v13  ;;  %v212_v32 = vpack.c.bf16 %v51_v29, %v50_v28  ;;  %v214_v33 = vpack.c.bf16 %v69_v31, %v68_v30  ;;  %v52_v34 = vld [vmem:[#allocation4 + $0x50] sm:$0xff]  ;;  %v53_v35 = vld [vmem:[#allocation4 + $0x58] sm:$0xff]  ;;  %v70_v36 = vld [vmem:[#allocation4 + $0xe0] sm:$0xff] }
  0x2e   :  { %203 = vmatprep.subr.bf16.mxu0 %v202_v14  ;;  %v71_v37 = vld [vmem:[#allocation4 + $0xe8] sm:$0xff]  ;;  %v216_v38 = vpack.c.bf16 %v53_v35, %v52_v34  ;;  %v54_v40 = vld [vmem:[#allocation4 + $0x60] sm:$0xff]  ;;  %v72_v42 = vld [vmem:[#allocation4 + $0xf0] sm:$0xff] }
  0x2f   :  { %v218_v39 = vpack.c.bf16 %v71_v37, %v70_v36  ;;  %v55_v41 = vld [vmem:[#allocation4 + $0x68] sm:$0xff]  ;;  %v73_v43 = vld [vmem:[#allocation4 + $0xf8] sm:$0xff]  ;;  %v56_v46 = vld [vmem:[#allocation4 + $0x70] sm:$0xff] }
  0x30   :  { %v220_v44 = vpack.c.bf16 %v55_v41, %v54_v40  ;;  %v222_v45 = vpack.c.bf16 %v73_v43, %v72_v42  ;;  %v57_v47 = vld [vmem:[#allocation4 + $0x78] sm:$0xff]  ;;  %v40_v49 = vld [vmem:[#allocation2] sm:$0xff] }
  0x31   :  { %205 = vmatpush3.bf16.msra.mxu0 %v204_v19  ;;  %v224_v48 = vpack.c.bf16 %v57_v47, %v56_v46  ;;  %v158_v51 = vld [vmem:[%s341_s2] ss:$0 sm:$0xff] }
  0x32   :  { %207 = vmatprep.subr.bf16.mxu0 %v206_v20 }
  0x35   :  { %209 = vmatpush3.bf16.msra.mxu0 %v208_v26 }
  0x36   :  { %211 = vmatprep.subr.bf16.mxu0 %v210_v27 }
  0x39   :  { %213 = vmatpush3.bf16.msra.mxu0 %v212_v32 }
  0x3a   :  { %215 = vmatprep.subr.bf16.mxu0 %v214_v33 }
  0x3d   :  { %217 = vmatpush3.bf16.msra.mxu0 %v216_v38 }
  0x3e   :  { %219 = vmatprep.subr.bf16.mxu0 %v218_v39 }
  0x41   :  { %221 = vmatpush3.bf16.msra.mxu0 %v220_v44 }
  0x42   :  { %223 = vmatprep.subr.bf16.mxu0 %v222_v45 }
  0x45   :  { %225 = vmatpush3.bf16.msra.mxu0 %v224_v48 }
  0x48   :  { %146 = vmatmul.mubr.f32.vlgmr.msra.gmra.mrb[0].mxu0 %v40_v49 }
 0x11b   :  { %v191_v50 = vpop.f32.mrb[0].mxu0 }
 0x11c   :  { %v192_v52 = vpop.f32.mrb[1].mxu0 }
 0x11d   :  { %v193_v53 = vadd.f32 %v192_v52, %v191_v50 }
 0x11f   :  { %v148_v54 = vadd.f32 %v193_v53, %v158_v51 }
 0x121   :  { %151 = vst [vmem:[%s342_s3] sm:$0xff] %v148_v54 }
 0x122   :  { %156 = vsyncpa [#allocation3], 1 }
 0x123   :  { %157 = vsyncpa [#allocation5], 1 }

</bundles_post_ra>
